<compile_context>
chip_gen: v5e
topology: v5e:2x2
jax: 0.10.0
libtpu: 0.0.40
codegen_flags: <defaults>
</compile_context>

<pallas_src>
import math

import jax
import jax.numpy as jnp
from jax.experimental import pallas as pl
from jax.experimental.pallas import tpu as pltpu

_LANE_CANDIDATES = (2048, 1024, 512, 256, 128)
_MIN_PALLAS_BYTES = 1 << 20  # below this, a fused XLA multiply beats launch overhead


def _device_block_params():
    """(target block bytes, vmem_limit_bytes) tuned per TPU generation."""
    kind = ""
    try:
        kind = jax.devices()[0].device_kind.lower()
    except Exception:
        pass
    if "v7" in kind:
        # ~3.2 TB/s per TC but only 64 MiB physical VMEM: 6 MiB blocks,
        # in+out double-buffered = 24 MiB, keep the scoped limit well under 64 MiB.
        return 6 << 20, 48 << 20
    if "v6" in kind:
        return 4 << 20, 48 << 20
    # v5e / unknown: default scoped VMEM is only 16 MiB -> raise it explicitly.
    return 2 << 20, 32 << 20


def _sublane_multiple(itemsize):
    # f32 -> 8 rows/vreg, bf16 -> 16, int8/fp8 -> 32 (sub-32-bit packs along sublanes).
    return max(8, 32 // max(1, itemsize))


def _pick_lane_tile(F):
    """Widest multiple-of-128 divisor of F from a bounded candidate list, or None."""
    for c in _LANE_CANDIDATES:
        if F % c == 0:
            return c
    return None


def _drop_path_kernel(x_ref, s_ref, o_ref):
    # x_ref / o_ref: (TILE_R, TILE_C) fused-row block spanning multiple samples.
    # s_ref: (TILE_R, 1) f32 per-row scale in {0, 1/keep_prob}, broadcast over lanes.
    o_ref[...] = (x_ref[...].astype(jnp.float32) * s_ref[...]).astype(o_ref.dtype)


def _xla_drop_path(x, scale):
    shape = (x.shape[0],) + (1,) * (x.ndim - 1)
    return (x.astype(jnp.float32) * scale.reshape(shape)).astype(x.dtype)


def drop_path(x, drop_prob: float = 0.0, training: bool = False, *, key=None,
              force_pallas: bool = False):
    """Pallas DropPath. x has batch as dim 0 (e.g. NCHW / BSD)."""
    if drop_prob == 0.0 or not training:
        return x
    if key is None:
        raise ValueError("drop_path requires an explicit PRNG `key` when active.")

    keep_prob = 1.0 - drop_prob
    B = x.shape[0]
    F = int(math.prod(x.shape[1:]))
    itemsize = jnp.dtype(x.dtype).itemsize

    # Per-sample scale = floor(keep_prob + u) * (1/keep_prob), computed once in f32
    # (hoisted out of the memory-bound hot loop).
    rand = jax.random.uniform(key, (B,), dtype=jnp.float32)
    scale = jnp.floor(keep_prob + rand) * (1.0 / keep_prob)  # (B,) in {0, 1/keep_prob}

    tile_c = _pick_lane_tile(F)
    total_bytes = B * F * itemsize
    if tile_c is None or (not force_pallas and total_bytes < _MIN_PALLAS_BYTES):
        # No lane-dense factorization of F, or the tensor is so small that launch /
        # per-step overhead dominates: a fused XLA broadcast multiply is already at
        # the HBM roofline and avoids any pad/slice extra passes.
        return _xla_drop_path(x, scale)

    rows = F // tile_c
    total_rows = B * rows

    target_block, vmem_limit = _device_block_params()
    sub = _sublane_multiple(itemsize)
    target_rows = max(sub, (target_block // (tile_c * itemsize)) // sub * sub)

    if total_rows <= target_rows:
        tile_r = total_rows  # full-extent dim: exempt from the 8-row divisibility rule
    else:
        tile_r = target_rows  # multiple of the dtype-native sublane tile

    grid = (pl.cdiv(total_rows, tile_r),)

    x2 = x.reshape(total_rows, tile_c)                 # free reshape (row-major)
    scale_rows = jnp.repeat(scale, rows)[:, None]      # (total_rows, 1) f32, <1% traffic

    out2 = pl.pallas_call(
        _drop_path_kernel,
        out_shape=jax.ShapeDtypeStruct((total_rows, tile_c), x.dtype),
        grid_spec=pltpu.PrefetchScalarGridSpec(
            num_scalar_prefetch=0,
            grid=grid,
            in_specs=[
                pl.BlockSpec((tile_r, tile_c), lambda r: (r, 0)),
                pl.BlockSpec((tile_r, 1), lambda r: (r, 0)),
            ],
            out_specs=pl.BlockSpec((tile_r, tile_c), lambda r: (r, 0)),
        ),
        compiler_params=pltpu.CompilerParams(
            dimension_semantics=("parallel",),
            vmem_limit_bytes=vmem_limit,
        ),
        cost_estimate=pl.CostEstimate(
            flops=B * F,
            transcendentals=0,
            bytes_accessed=2 * B * F * itemsize + total_rows * 4,
        ),
    )(x2, scale_rows)

    return out2.reshape(x.shape)


class DropPath:
    """Mirror of the PyTorch module. No parameters; only drop_prob config."""

    def __init__(self, drop_prob=None):
        self.drop_prob = float(drop_prob) if drop_prob is not None else 0.0
        self.training = True

    def __call__(self, x, *, key=None, force_pallas=False):
        return drop_path(x, self.drop_prob, self.training, key=key,
                         force_pallas=force_pallas)


if __name__ == "__main__":
    key = jax.random.PRNGKey(0)
    k_x, k_drop = jax.random.split(key)

    drop_prob = 0.25
    keep_prob = 1.0 - drop_prob
    module = DropPath(drop_prob=drop_prob)
    module.training = True

    # NCHW input consistent with a conv-style residual block.  Force the Pallas
    # path (auto mode would route a tensor this tiny to the fused XLA multiply).
    B, C, H, W = 2, 4, 16, 16
    x = jax.random.normal(k_x, (B, C, H, W), dtype=jnp.float32)
    out = jax.block_until_ready(module(x, key=k_drop, force_pallas=True))

    rand = jax.random.uniform(k_drop, (B,), dtype=jnp.float32)
    mask = jnp.floor(keep_prob + rand).reshape(B, 1, 1, 1)
    ref = x / keep_prob * mask
    assert out.shape == x.shape and out.dtype == x.dtype
    assert jnp.allclose(out, ref, atol=1e-6, rtol=1e-6), "mismatch vs reference (f32)"

    # bf16 input exercises the dtype-aware sublane tiling (multiply in f32, cast on store).
    x_bf = jax.random.normal(k_x, (2, 3, 8, 64), dtype=jnp.bfloat16)
    out_bf = jax.block_until_ready(module(x_bf, key=k_drop, force_pallas=True))
    mask_bf = jnp.floor(keep_prob + rand).reshape(2, 1, 1, 1)
    ref_bf = (x_bf.astype(jnp.float32) / keep_prob * mask_bf).astype(jnp.bfloat16)
    assert out_bf.dtype == jnp.bfloat16
    assert jnp.allclose(out_bf.astype(jnp.float32), ref_bf.astype(jnp.float32),
                        atol=1e-2, rtol=1e-2), "mismatch vs reference (bf16)"

    # Non-128-divisible feature size: routed to the fused XLA multiply
    # (no pad + slice round trip over HBM).
    x_odd = jax.random.normal(k_x, (2, 3, 7, 7), dtype=jnp.float32)
    out_odd = jax.block_until_ready(module(x_odd, key=k_drop))
    rand2 = jax.random.uniform(k_drop, (2,), dtype=jnp.float32)
    mask2 = jnp.floor(keep_prob + rand2).reshape(2, 1, 1, 1)
    ref_odd = x_odd / keep_prob * mask2
    assert jnp.allclose(out_odd, ref_odd, atol=1e-6, rtol=1e-6), "mismatch (fallback path)"

    # Eval mode / zero-prob: identity.
    module.training = False
    out_eval = jax.block_until_ready(module(x))
    assert jnp.array_equal(out_eval, x)

    print("KERNEL_OK")
</pallas_src>

<mosaic_0001>
module attributes {stable_mosaic.version = 11 : i64} {
  func.func @_drop_path_kernel(%arg0: i32, %arg1: memref<2x1024xf32, #tpu.memory_space<vmem>>, %arg2: memref<2x1xf32, #tpu.memory_space<vmem>>, %arg3: memref<2x1024xf32, #tpu.memory_space<vmem>>) attributes {dimension_semantics = [#tpu.dimension_semantics<parallel>], iteration_bounds = array<i64: 1>, scalar_prefetch = 0 : i64, scratch_operands = 0 : i64, tpu.core_type = #tpu.core_type<tc>, window_params = [{transform_indices = @transform_0, window_bounds = array<i64: 2, 1024>}, {transform_indices = @transform_1, window_bounds = array<i64: 2, 1>}, {transform_indices = @transform_2, window_bounds = array<i64: 2, 1024>}]} {
    %c0 = arith.constant 0 : index
    %c0_0 = arith.constant 0 : index
    %0 = vector.load %arg1[%c0, %c0_0] : memref<2x1024xf32, #tpu.memory_space<vmem>>, vector<2x1024xf32>
    %c0_1 = arith.constant 0 : index
    %c0_2 = arith.constant 0 : index
    %1 = vector.load %arg2[%c0_1, %c0_2] : memref<2x1xf32, #tpu.memory_space<vmem>>, vector<2x1xf32>
    %2 = vector.broadcast %1 : vector<2x1xf32> to vector<2x1024xf32>
    %3 = arith.mulf %0, %2 : vector<2x1024xf32>
    %c0_3 = arith.constant 0 : index
    %c0_4 = arith.constant 0 : index
    %4 = vector.load %arg3[%c0_3, %c0_4] : memref<2x1024xf32, #tpu.memory_space<vmem>>, vector<2x1024xf32>
    tpu.vector_store %arg3[%c0_3, %c0_4], %3 {strides = array<i32>} : memref<2x1024xf32, #tpu.memory_space<vmem>>, vector<2x1024xf32>,
    return
  }
  func.func @transform_0(%arg0: i32) -> (i32, i32) {
    %c0_i32 = arith.constant 0 : i32
    %c0_i32_0 = arith.constant 0 : i32
    return %arg0, %c0_i32 : i32, i32
  }
  func.func @transform_1(%arg0: i32) -> (i32, i32) {
    %c0_i32 = arith.constant 0 : i32
    %c0_i32_0 = arith.constant 0 : i32
    return %arg0, %c0_i32 : i32, i32
  }
  func.func @transform_2(%arg0: i32) -> (i32, i32) {
    %c0_i32 = arith.constant 0 : i32
    %c0_i32_0 = arith.constant 0 : i32
    return %arg0, %c0_i32 : i32, i32
  }
}

</mosaic_0001>

<bundles_post_ra>
// kernel: tpu_custom_call.1
= control target key start
LH: loop header
LB: loop body
LE: loop exit
PB: predicated region body
PF: predicated region fallthrough
CT: control target
= control target key end

     0   :  { %7 = vsyncpa [#allocation3], 0  ;;  %s144_s0 = inlined_call_operand.hbm [shape: f32[2,1024], index: 0, kind: input, shape index: {}]   ;;  %s145_s1 = inlined_call_operand.vmem [shape: f32[2,1], index: 1, kind: input, shape index: {}]   ;;  %s146_s2 = inlined_call_operand.hbm [shape: f32[2,1024], index: 2, kind: output, shape index: {}]  }
   0x1   :  { %8 = vsyncpa [#allocation4], 0  ;;  %s14_s11 = sshll.u32 %s144_s0, 4  ;;  %s116_s12 = smov [#allocation2]   ;;  %s15_s11 = int_to_ptr.hbm [resolvable:$true] %s14_s11 }
   0x2   :  { %s16_s13 = sshll.u32 %s116_s12, 4  ;;  %s17_s13 = int_to_ptr.vmem [resolvable:$true] %s16_s13 }
   0x3   :  { %19 = dma.hbm_to_vmem [thread:$0]  %s15_s11, 256, %s17_s13, [#allocation3]  }
   0x4   :  { %112 = dma.done.wait [#allocation3], 256  }
   0x5   :  { %113 = vsyncadd [#allocation3], 4294967040  ;;  %v117_v0 = vmov 0   ;;  %v28_v1 = vld [vmem:[%s145_s1] sm:$0x3]  ;;  %v27_v7 = vld [vmem:[#allocation2 + $0x8] sm:$0xff] }
   0x6   :  { %63 = vset.pattern.permute.xlu0 %v117_v0  ;;  %v118_v2 = vmov 269488144   ;;  %v26_v6 = vld [vmem:[#allocation2] sm:$0xff]  ;;  %s119_s0 = smov [#allocation5]   ;;  %s49_s19 = sshll.u32 %s146_s2, 4  ;;  %s50_s19 = int_to_ptr.hbm [resolvable:$true] %s49_s19 }
   0x7   :  { %31 = vperm.xlu0 %63, %v28_v1   ;;  %v34_v3 = vunpack.c.l.s4 %v118_v2  ;;  %s47_s16 = sshll.u32 %s119_s0, 4  ;;  %s48_s16 = int_to_ptr.vmem [resolvable:$true] %s47_s16 }
   0x9   :  { %v35_v4 = vunpack.c.0.s8 %v34_v3 }
  0x79   :  { %v32_v5 = vpop.permute.xlu0 %31 }
  0x7a   :  { %v36_v8 = vperm.slane %v32_v5, %v35_v4 }
  0x7c   :  { %v38_v9 = vmul.f32 %v36_v8, %v26_v6  ;;  %v39_v10 = vmul.f32 %v36_v8, %v27_v7 }
  0x7e   :  { %40 = vst [vmem:[#allocation5] sm:$0xff] %v38_v9 }
  0x7f   :  { %41 = vst [vmem:[#allocation5 + $0x8] sm:$0xff] %v39_v10 }
  0x80   :  { %52 = dma.vmem_to_hbm [thread:$0]  %s48_s16, 256, %s50_s19, [#allocation4]  }
  0x81   :  { %114 = dma.done.wait [#allocation4], 256  }
  0x82   :  { %115 = vsyncadd [#allocation4], 4294967040 }
  0x83   :  { %57 = vsyncpa [#allocation3], 1 }
  0x84   :  { %58 = vsyncpa [#allocation4], 1 }

</bundles_post_ra>
